<compile_context>
chip_gen: v7x
topology: tpu7x:2x2x1
jax: 0.10.0
libtpu: 0.0.40
codegen_flags: <defaults>
</compile_context>

<pallas_src>
import numpy as np
import jax
import jax.numpy as jnp
from jax.experimental import pallas as pl
from jax.experimental.pallas import tpu as pltpu


# ---------------------------------------------------------------------------
# Kernel: elementwise broadcast add. b block is (1, tile_lanes) (row bias) or
# (tile_rows, 1) (column bias); jnp broadcasting covers both.
# ---------------------------------------------------------------------------
def _add_kernel(x_ref, b_ref, o_ref):
    o_ref[...] = x_ref[...] + b_ref[...]


# ---------------------------------------------------------------------------
# Tiling helpers
# ---------------------------------------------------------------------------
def _target_tile_bytes():
    """Generation-aware per-tile byte budget (2 streams x 2 buffers live)."""
    try:
        kind = jax.devices()[0].device_kind.lower()
    except Exception:
        return 2 << 20
    if "v6" in kind or "v7" in kind or "7x" in kind:
        return 4 << 20  # 32 MiB scoped default -> 4 MiB tiles leave headroom
    return 2 << 20      # v5e: 16 MiB scoped default -> stay small


def _choose_tiles(rows, feat, itemsize, target_bytes):
    """Pick (tile_rows, tile_lanes) under the byte budget.

    Block-shape legality: each dim is either a multiple of (8, 128) or equals
    the full array dim.
    """
    # Lane tile: full width unless even an 8-row stripe would blow the budget.
    if feat <= 128 or 8 * feat * itemsize <= target_bytes:
        tile_lanes = feat
    else:
        tile_lanes = (target_bytes // (8 * itemsize)) // 128 * 128
        tile_lanes = max(128, min(tile_lanes, feat))
        if tile_lanes != feat:
            tile_lanes = (tile_lanes // 128) * 128

    # Row tile: byte-capped only (no artificial max_rows clamp).
    t = max(8, (target_bytes // max(1, tile_lanes * itemsize)) // 8 * 8)
    if rows <= t:
        tile_rows = rows  # full dim -> always a legal block shape
        # Guarantee >= 2 row steps when possible so both v7x TensorCores
        # (and their DMA paths) get work.
        if rows > 8:
            half = (((rows + 1) // 2) + 7) // 8 * 8
            if half < rows:
                tile_rows = half
    else:
        tile_rows = t
    return tile_rows, tile_lanes


# ---------------------------------------------------------------------------
# Generic Pallas worker: (rows, feat) + bias, bias is (1, feat) or (rows, 1).
# ---------------------------------------------------------------------------
def _pallas_broadcast_add(x2d, b2d):
    rows, feat = x2d.shape
    out_dtype = x2d.dtype
    itemsize = jnp.dtype(out_dtype).itemsize
    tile_rows, tile_lanes = _choose_tiles(rows, feat, itemsize,
                                          _target_tile_bytes())
    grid = (pl.cdiv(rows, tile_rows), pl.cdiv(feat, tile_lanes))

    if b2d.shape[0] == 1:
        # Row bias: resident across the row axis, indexed by the lane axis.
        b_spec = pl.BlockSpec((1, tile_lanes), lambda i, j: (0, j))
    else:
        # Column bias: tiny (tile_rows, 1) block, constant across lane axis
        # (same block index across j -> no re-fetch between lane steps).
        b_spec = pl.BlockSpec((tile_rows, 1), lambda i, j: (i, 0))

    return pl.pallas_call(
        _add_kernel,
        out_shape=jax.ShapeDtypeStruct((rows, feat), out_dtype),
        grid=grid,
        in_specs=[
            pl.BlockSpec((tile_rows, tile_lanes), lambda i, j: (i, j)),
            b_spec,
        ],
        out_specs=pl.BlockSpec((tile_rows, tile_lanes), lambda i, j: (i, j)),
        compiler_params=pltpu.CompilerParams(
            dimension_semantics=("parallel", "parallel")),
    )(x2d, b2d)


# ---------------------------------------------------------------------------
# Layout wrappers
# ---------------------------------------------------------------------------
def _add_bias_2d(x, bias_flat):
    """(B, D) + (1, D)."""
    rows, feat = x.shape
    out_dtype = jnp.promote_types(x.dtype, bias_flat.dtype)
    x = x.astype(out_dtype)
    b = bias_flat.astype(out_dtype)

    # Lane-dense fold: view (rows, feat) as (rows_p/f, f*feat == 128) so every
    # store is a full-width unmasked vst. Pad rows to a multiple of f if
    # needed (padded rows are sliced off afterwards).
    if 0 < feat < 128 and 128 % feat == 0:
        f = 128 // feat
        rows_p = -(-rows // f) * f
        xp = x if rows_p == rows else jnp.pad(x, ((0, rows_p - rows), (0, 0)))
        y = _pallas_broadcast_add(xp.reshape(rows_p // f, f * feat),
                                  jnp.tile(b, f).reshape(1, f * feat))
        y = y.reshape(rows_p, feat)
        return y if rows_p == rows else y[:rows]

    return _pallas_broadcast_add(x, b.reshape(1, feat))


def _add_bias_nchw(x, bias_flat):
    """(N, C, H, W) + (1, C, 1, 1) — contiguous views only, no transposes."""
    n, c, h, w = x.shape
    hw = h * w
    out_dtype = jnp.promote_types(x.dtype, bias_flat.dtype)
    x = x.astype(out_dtype)
    b = bias_flat.astype(out_dtype)

    if hw >= 128 and hw % 128 == 0:
        # Lane dim H*W is already 128-dense: (N*C, H*W) + per-row bias column.
        y = _pallas_broadcast_add(x.reshape(n * c, hw),
                                  jnp.tile(b, n).reshape(n * c, 1))
    else:
        # Small / odd feature maps: (N, C*H*W) + resident repeated bias row.
        # Avoids per-step bias-column DMA and keeps the lane dim large.
        y = _pallas_broadcast_add(x.reshape(n, c * hw),
                                  jnp.repeat(b, hw).reshape(1, c * hw))
    return y.reshape(n, c, h, w)


class AddBias:
    """JAX/Pallas port of the PyTorch AddBias module.

    Parameter is stored as (D, 1), like nn.Parameter(bias.unsqueeze(1)).
    `min_pallas_bytes`: inputs smaller than this use a plain fused XLA add
    (strictly faster than any pallas_call at cartpole-PPO sizes). Set to 0 to
    force the Pallas path (used by the self-test below).
    """

    def __init__(self, bias_1d, min_pallas_bytes=1 << 20):
        self._bias = jnp.asarray(bias_1d).reshape(-1, 1)
        self._min_pallas_bytes = int(min_pallas_bytes)

    def __call__(self, x):
        d = self._bias.shape[0]
        bias_flat = self._bias.reshape(d)  # == self._bias.t().view(-1)
        out_dtype = jnp.promote_types(x.dtype, bias_flat.dtype)
        total_bytes = x.size * jnp.dtype(out_dtype).itemsize

        if x.ndim == 2:
            assert x.shape[1] == d, (x.shape, d)
            if total_bytes < self._min_pallas_bytes:
                return x + bias_flat.reshape(1, d)          # XLA fast path
            return _add_bias_2d(x, bias_flat)
        elif x.ndim == 4:
            assert x.shape[1] == d, (x.shape, d)
            if total_bytes < self._min_pallas_bytes:
                return x + bias_flat.reshape(1, d, 1, 1)     # XLA fast path
            return _add_bias_nchw(x, bias_flat)
        else:
            raise ValueError(f"unsupported rank {x.ndim}")


if __name__ == "__main__":
    key = jax.random.PRNGKey(0)
    k_bias, k_x2, k_x2b, k_x2c, k_x4, k_x4b = jax.random.split(key, 6)

    # --- 2-D case: (B, D) ---------------------------------------------------
    D = 32
    bias = jax.random.normal(k_bias, (D,), dtype=jnp.float32)
    mod_fast = AddBias(bias)                      # default: XLA fast path
    mod_pallas = AddBias(bias, min_pallas_bytes=0)  # force Pallas kernel

    B = 2
    x2 = jax.random.normal(k_x2, (B, D), dtype=jnp.float32)
    ref2 = np.asarray(x2) + np.asarray(bias).reshape(1, D)
    for mod in (mod_fast, mod_pallas):
        y2 = jax.block_until_ready(mod(x2))
        assert y2.shape == (B, D) and y2.dtype == x2.dtype
        assert np.allclose(np.asarray(y2), ref2, atol=1e-6)

    # --- 2-D case exercising the lane-dense fold (rows % f == 0) ------------
    x2b = jax.random.normal(k_x2b, (8, D), dtype=jnp.float32)
    y2b = jax.block_until_ready(mod_pallas(x2b))
    assert np.allclose(np.asarray(y2b),
                       np.asarray(x2b) + np.asarray(bias).reshape(1, D),
                       atol=1e-6)

    # --- 2-D case exercising the padded fold + >=2 row-tile grid ------------
    x2c = jax.random.normal(k_x2c, (250, D), dtype=jnp.float32)  # 250 % 4 != 0
    y2c = jax.block_until_ready(mod_pallas(x2c))
    assert y2c.shape == (250, D)
    assert np.allclose(np.asarray(y2c),
                       np.asarray(x2c) + np.asarray(bias).reshape(1, D),
                       atol=1e-6)

    # --- 4-D case: NCHW with H*W a multiple of 128 (column-bias layout) -----
    C, H, W = 4, 16, 16
    bias4 = jax.random.normal(k_bias, (C,), dtype=jnp.float32)
    mod4 = AddBias(bias4, min_pallas_bytes=0)
    x4 = jax.random.normal(k_x4, (2, C, H, W), dtype=jnp.float32)
    y4 = jax.block_until_ready(mod4(x4))
    ref4 = np.asarray(x4) + np.asarray(bias4).reshape(1, C, 1, 1)
    assert y4.shape == x4.shape and y4.dtype == x4.dtype
    assert np.allclose(np.asarray(y4), ref4, atol=1e-6)

    # --- 4-D case: small feature map (H*W not a multiple of 128) ------------
    x4b = jax.random.normal(k_x4b, (2, C, 7, 7), dtype=jnp.float32)
    y4b = jax.block_until_ready(mod4(x4b))
    ref4b = np.asarray(x4b) + np.asarray(bias4).reshape(1, C, 1, 1)
    assert np.allclose(np.asarray(y4b), ref4b, atol=1e-6)

    print("KERNEL_OK")
</pallas_src>

<mosaic_0001>
module attributes {stable_mosaic.version = 11 : i64} {
  func.func @_add_kernel(%arg0: i32, %arg1: i32, %arg2: memref<1x128xf32, #tpu.memory_space<vmem>>, %arg3: memref<1x128xf32, #tpu.memory_space<vmem>>, %arg4: memref<1x128xf32, #tpu.memory_space<vmem>>) attributes {dimension_semantics = [#tpu.dimension_semantics<parallel>, #tpu.dimension_semantics<parallel>], iteration_bounds = array<i64: 1, 1>, scalar_prefetch = 0 : i64, scratch_operands = 0 : i64, tpu.core_type = #tpu.core_type<tc>, window_params = [{transform_indices = @transform_0, window_bounds = array<i64: 1, 128>}, {transform_indices = @transform_1, window_bounds = array<i64: 1, 128>}, {transform_indices = @transform_2, window_bounds = array<i64: 1, 128>}]} {
    %c0 = arith.constant 0 : index
    %c0_0 = arith.constant 0 : index
    %0 = vector.load %arg2[%c0, %c0_0] : memref<1x128xf32, #tpu.memory_space<vmem>>, vector<1x128xf32>
    %c0_1 = arith.constant 0 : index
    %c0_2 = arith.constant 0 : index
    %1 = vector.load %arg3[%c0_1, %c0_2] : memref<1x128xf32, #tpu.memory_space<vmem>>, vector<1x128xf32>
    %2 = arith.addf %0, %1 : vector<1x128xf32>
    %c0_3 = arith.constant 0 : index
    %c0_4 = arith.constant 0 : index
    %3 = vector.load %arg4[%c0_3, %c0_4] : memref<1x128xf32, #tpu.memory_space<vmem>>, vector<1x128xf32>
    tpu.vector_store %arg4[%c0_3, %c0_4], %2 {strides = array<i32>} : memref<1x128xf32, #tpu.memory_space<vmem>>, vector<1x128xf32>,
    return
  }
  func.func @transform_0(%arg0: i32, %arg1: i32) -> (i32, i32) {
    %c0_i32 = arith.constant 0 : i32
    return %arg0, %arg1 : i32, i32
  }
  func.func @transform_1(%arg0: i32, %arg1: i32) -> (i32, i32) {
    %c0_i32 = arith.constant 0 : i32
    %c0_i32_0 = arith.constant 0 : i32
    return %c0_i32, %arg1 : i32, i32
  }
  func.func @transform_2(%arg0: i32, %arg1: i32) -> (i32, i32) {
    %c0_i32 = arith.constant 0 : i32
    return %arg0, %arg1 : i32, i32
  }
}

</mosaic_0001>

<bundles_post_ra>
// kernel: tpu_custom_call.1
= control target key start
LH: loop header
LB: loop body
LE: loop exit
PB: predicated region body
PF: predicated region fallthrough
CT: control target
= control target key end

     0   :  { %7 = vsyncpa [#allocation3], 0  ;;  %s137_s0 = inlined_call_operand.hbm [shape: f32[1,128], index: 0, kind: input, shape index: {}]   ;;  %s138_s1 = inlined_call_operand.vmem [shape: f32[1,128], index: 1, kind: input, shape index: {}]   ;;  %s139_s2 = inlined_call_operand.hbm [shape: f32[1,128], index: 2, kind: output, shape index: {}]  }
   0x1   :  { %8 = vsyncpa [#allocation4], 0  ;;  %s93_s9 = smov [#allocation2]   ;;  %s45_s13 = scalar_lea.hbm %s137_s0, 16 }
   0x2   :  { %s15_s10 = sshll.u32 %s93_s9, 4  ;;  %p46_p0 = scmp.ne.s32.totalorder %s137_s0, %s45_s13  ;;  %s16_s10 = int_to_ptr.vmem [resolvable:$true] %s15_s10 }
   0x3   :  { %p49_p1 = scmp.lt.u32.totalorder %s45_s13, %s137_s0 }
   0x5   :  { %p51_p2 = pnand %p49_p1, %p46_p0 }
   0x7   :  { %54 = shalt.err (!%p51_p2)
}
   0x8   :  { %s55_s18 = scalar_lea.vmem %s16_s10, 16  ;;  %s59_s19 = scalar_lea.vmem %s16_s10, 32 }
   0x9   :  { %p56_p3 = scmp.ne.s32.totalorder %s16_s10, %s55_s18  ;;  %p60_p4 = scmp.lt.s32.totalorder %s16_s10, %s16_s10 }
   0xa   :  { %p61_p5 = scmp.lt.s32.totalorder %s59_s19, %s55_s18 }
   0xc   :  { %p62_p6 = por %p61_p5, %p60_p4 }
   0xe   :  { %p63_p7 = pnand %p62_p6, %p56_p3 }
  0x10   :  { %66 = shalt.err (!%p63_p7)
}
  0x11   :  { %18 = dma.hbm_to_vmem [thread:$0]  %s137_s0, 16, %s16_s10, [#allocation3]  }
  0x12   :  { %89 = dma.done.wait [#allocation3], 16  }
  0x13   :  { %90 = vsyncadd [#allocation3], 4294967280  ;;  %s94_s22 = smov [#allocation5]   ;;  %v24_v0 = vld [vmem:[#allocation2] sm:$0x1] }
  0x14   :  { %s34_s23 = sshll.u32 %s94_s22, 4  ;;  %v25_v1 = vld [vmem:[%s138_s1] sm:$0x1]  ;;  %s35_s23 = int_to_ptr.vmem [resolvable:$true] %s34_s23 }
  0x15   :  { %v26_v2 = vadd.f32 %v25_v1, %v24_v0  ;;  %s67_s26 = scalar_lea.vmem %s35_s23, 16  ;;  %s71_s27 = scalar_lea.vmem %s35_s23, 32 }
  0x16   :  { %p68_p8 = scmp.ne.s32.totalorder %s35_s23, %s67_s26  ;;  %p72_p9 = scmp.lt.s32.totalorder %s35_s23, %s35_s23 }
  0x17   :  { %27 = vst [vmem:[#allocation5] sm:$0x1] %v26_v2  ;;  %p73_p10 = scmp.lt.s32.totalorder %s71_s27, %s67_s26 }
  0x19   :  { %p74_p11 = por %p73_p10, %p72_p9 }
  0x1b   :  { %p75_p12 = pnand %p74_p11, %p68_p8 }
  0x1d   :  { %78 = shalt.err (!%p75_p12)
}
  0x1e   :  { %s79_s29 = scalar_lea.hbm %s139_s2, 16 }
  0x1f   :  { %p80_p13 = scmp.ne.s32.totalorder %s139_s2, %s79_s29  ;;  %p83_p0 = scmp.lt.u32.totalorder %s79_s29, %s139_s2 }
  0x21   :  { %p85_p1 = pnand %p83_p0, %p80_p13 }
  0x23   :  { %88 = shalt.err (!%p85_p1)
}
  0x24   :  { %37 = dma.vmem_to_hbm [thread:$0]  %s35_s23, 16, %s139_s2, [#allocation4]  }
  0x25   :  { %91 = dma.done.wait [#allocation4], 16  }
  0x26   :  { %92 = vsyncadd [#allocation4], 4294967280 }
  0x27   :  { %41 = vsyncpa [#allocation3], 1 }
  0x28   :  { %42 = vsyncpa [#allocation4], 1 }

</bundles_post_ra>
